<compile_context>
chip_gen: v6e
topology: v6e:2x2x1
jax: 0.10.0
libtpu: 0.0.40
codegen_flags: <defaults>
</compile_context>

<pallas_src>
import jax
import jax.numpy as jnp
from jax import lax
from jax.experimental import pallas as pl
from jax.experimental.pallas import tpu as pltpu


def _round_up(v, m):
    return ((v + m - 1) // m) * m


def _largest_divisor_leq(n, cap):
    cap = max(1, min(n, cap))
    for d in range(cap, 0, -1):
        if n % d == 0:
            return d
    return 1


def _patch_embed_kernel(x_ref, w_ref, b_ref, o_ref):
    # Hot path: per-image patch-projection matmuls on the MXU (bf16 operands,
    # f32 accumulation) + bias add on the VPU.  The loop is a static unroll
    # over the small images-per-block count; weight/bias stay VMEM-resident
    # across the whole grid (constant index_map).
    w = w_ref[...]
    b = b_ref[...]
    for i in range(x_ref.shape[0]):
        acc = jnp.dot(x_ref[i], w, preferred_element_type=jnp.float32)
        o_ref[i] = (acc + b).astype(o_ref.dtype)


def patch_embed(x, weight, bias, patch_size, *, target_rows=2048,
                out_dtype=jnp.bfloat16):
    """x: (B, C, H, W)   weight: (E, C, p, p)   bias: (E,)
    Returns (B, num_patches, E) == PyTorch PatchEmbed.forward(x).

    target_rows: approximate number of output patch rows per grid step.
      2048 is safe on v7x (64 MiB VMEM); 2048-4096 is fine on v5e/v6e
      (128 MiB VMEM).  Operands are bf16, accumulation is f32; output is
      stored in `out_dtype` (bf16 by default)."""
    B, C, H, W = x.shape
    E = weight.shape[0]
    p = patch_size
    assert H % p == 0 and W % p == 0
    gh, gw = H // p, W // p
    num_patches = gh * gw
    K = C * p * p
    out_bytes = jnp.dtype(out_dtype).itemsize

    # --- glue: im2col done once, in bf16 (single fused XLA transpose+cast) --
    patches = x.astype(jnp.bfloat16).reshape(B, C, gh, p, gw, p)
    patches = jnp.transpose(patches, (0, 2, 4, 1, 3, 5))     # (B, gh, gw, C, p, p)
    patches = patches.reshape(B, num_patches, K)

    # conv weight (E, C, p, p) -> matmul weight (K, E), bf16 for the MXU.
    w_mat = jnp.transpose(weight.reshape(E, K)).astype(jnp.bfloat16)   # (K, E)
    b_mat = bias.astype(jnp.float32).reshape(1, E)

    # K alignment for the MXU / lane-aligned loads (no-op for C=3, p=16).
    K_pad = _round_up(K, 128)
    if K_pad != K:
        patches = jnp.pad(patches, ((0, 0), (0, 0), (0, K_pad - K)))
        w_mat = jnp.pad(w_mat, ((0, K_pad - K), (0, 0)))

    # --- tiling: whole images per grid step (no ragged/padded M, no post-slice)
    ipb = _largest_divisor_leq(B, max(1, target_rows // num_patches))
    # v7x has 2 TensorCores: prefer >=4 grid steps so each core can pipeline.
    while ipb > 1 and (B // ipb) < 4:
        ipb = _largest_divisor_leq(B, ipb - 1)
    grid_b = B // ipb

    # Advisory cost estimate so XLA schedules the surrounding im2col sensibly.
    cost = pl.CostEstimate(
        flops=2 * B * num_patches * K_pad * E,
        bytes_accessed=(B * num_patches * K_pad * 2 + K_pad * E * 2 + E * 4
                        + B * num_patches * E * out_bytes),
        transcendentals=0,
    )

    # Explicit VMEM budget: double-buffered patch/out tiles + resident
    # weight/bias.  Capped at 48 MiB so the same config fits v7x's 64 MiB
    # physical VMEM with headroom; v5e's 16 MiB scoped default needs the
    # explicit limit for larger tiles.
    vmem_bytes = (
        2 * ipb * num_patches * K_pad * 2            # patches tile (bf16), 2 bufs
        + 2 * ipb * num_patches * E * out_bytes      # output tile, 2 bufs
        + 2 * K_pad * E * 2                          # weight (bf16)
        + 2 * 8 * _round_up(E, 128) * 4              # bias (f32, padded layout)
    )
    vmem_limit = int(min(max(2 * vmem_bytes, 16 << 20), 48 << 20))

    out = pl.pallas_call(
        _patch_embed_kernel,
        out_shape=jax.ShapeDtypeStruct((B, num_patches, E), out_dtype),
        grid_spec=pltpu.PrefetchScalarGridSpec(
            num_scalar_prefetch=0,
            grid=(grid_b,),
            in_specs=[
                pl.BlockSpec((ipb, num_patches, K_pad), lambda i: (i, 0, 0)),
                pl.BlockSpec((K_pad, E), lambda i: (0, 0)),     # VMEM-resident
                pl.BlockSpec((1, E), lambda i: (0, 0)),         # VMEM-resident
            ],
            out_specs=pl.BlockSpec((ipb, num_patches, E), lambda i: (i, 0, 0)),
        ),
        compiler_params=pltpu.CompilerParams(
            dimension_semantics=("parallel",),   # independent images; dual-TC on v7x
            vmem_limit_bytes=vmem_limit,
        ),
        cost_estimate=cost,
    )(patches, w_mat, b_mat)

    return out   # already (B, num_patches, E); no unpad/slice/reshape needed


if __name__ == "__main__":
    # Small shapes consistent with the module: img 16x16, patch 4, 4 chans, 32-dim embed.
    B, C, H, W = 2, 4, 16, 16
    patch_size = 4
    embed_dim = 32

    key = jax.random.PRNGKey(0)
    kx, kw, kb = jax.random.split(key, 3)
    x = jax.random.normal(kx, (B, C, H, W), dtype=jnp.float32)
    # Deterministic synthetic Conv2d parameters (shapes from nn.Conv2d(C, E, p, p)).
    fan_in = C * patch_size * patch_size
    weight = jax.random.normal(kw, (embed_dim, C, patch_size, patch_size),
                               dtype=jnp.float32) * (1.0 / fan_in) ** 0.5
    bias = jax.random.normal(kb, (embed_dim,), dtype=jnp.float32) * 0.02

    out = patch_embed(x, weight, bias, patch_size)
    jax.block_until_ready(out)

    # Reference: plain-JAX strided conv on bf16-rounded inputs (matches the
    # kernel's bf16 operands / f32 accumulation) + bias, NCHW -> (B, N, E).
    x_r = x.astype(jnp.bfloat16).astype(jnp.float32)
    w_r = weight.astype(jnp.bfloat16).astype(jnp.float32)
    ref = lax.conv_general_dilated(
        x_r, w_r, window_strides=(patch_size, patch_size), padding="VALID",
        dimension_numbers=("NCHW", "OIHW", "NCHW")) + bias[None, :, None, None]
    ref = jnp.transpose(ref.reshape(B, embed_dim, -1), (0, 2, 1))

    num_patches = (H // patch_size) * (W // patch_size)
    assert out.shape == (B, num_patches, embed_dim)
    assert out.dtype == jnp.bfloat16
    assert jnp.allclose(out.astype(jnp.float32), ref, atol=2e-2, rtol=2e-2)

    print("KERNEL_OK")
</pallas_src>

<mosaic_0001>
module attributes {stable_mosaic.version = 11 : i64} {
  func.func @_patch_embed_kernel(%arg0: i32, %arg1: memref<1x16x128xbf16, #tpu.memory_space<vmem>>, %arg2: memref<128x32xbf16, #tpu.memory_space<vmem>>, %arg3: memref<1x32xf32, #tpu.memory_space<vmem>>, %arg4: memref<1x16x32xbf16, #tpu.memory_space<vmem>>) attributes {dimension_semantics = [#tpu.dimension_semantics<parallel>], iteration_bounds = array<i64: 2>, scalar_prefetch = 0 : i64, scratch_operands = 0 : i64, tpu.core_type = #tpu.core_type<tc>, window_params = [{transform_indices = @transform_0, window_bounds = array<i64: 1, 16, 128>}, {pipeline_mode = #tpu.pipeline_mode<synchronous>, transform_indices = @transform_1, window_bounds = array<i64: 128, 32>}, {pipeline_mode = #tpu.pipeline_mode<synchronous>, transform_indices = @transform_2, window_bounds = array<i64: 1, 32>}, {transform_indices = @transform_3, window_bounds = array<i64: 1, 16, 32>}]} {
    %c0 = arith.constant 0 : index
    %c0_0 = arith.constant 0 : index
    %0 = vector.load %arg2[%c0, %c0_0] : memref<128x32xbf16, #tpu.memory_space<vmem>>, vector<128x32xbf16>
    %c0_1 = arith.constant 0 : index
    %c0_2 = arith.constant 0 : index
    %1 = vector.load %arg3[%c0_1, %c0_2] : memref<1x32xf32, #tpu.memory_space<vmem>>, vector<1x32xf32>
    %c0_3 = arith.constant 0 : index
    %c0_4 = arith.constant 0 : index
    %c0_5 = arith.constant 0 : index
    %2 = vector.load %arg1[%c0_3, %c0_4, %c0_5] : memref<1x16x128xbf16, #tpu.memory_space<vmem>>, vector<1x16x128xbf16>
    %3 = vector.shape_cast %2 : vector<1x16x128xbf16> to vector<16x128xbf16>
    %cst = arith.constant dense<0.000000e+00> : vector<16x32xf32>
    %4 = tpu.matmul %3, %0, %cst {dimension_numbers = #tpu.dot_dimension_numbers<[1], [0], [0], [1], [0, 0, 1, 1], [], []>} : vector<16x128xbf16>, vector<128x32xbf16>, vector<16x32xf32> -> vector<16x32xf32>
    %5 = vector.broadcast %1 : vector<1x32xf32> to vector<16x32xf32>
    %6 = arith.addf %4, %5 : vector<16x32xf32>
    %7 = arith.truncf %6 : vector<16x32xf32> to vector<16x32xbf16>
    %c0_6 = arith.constant 0 : index
    %c0_7 = arith.constant 0 : index
    %c0_8 = arith.constant 0 : index
    %8 = vector.load %arg4[%c0_6, %c0_7, %c0_8] : memref<1x16x32xbf16, #tpu.memory_space<vmem>>, vector<1x16x32xbf16>
    %9 = vector.shape_cast %8 : vector<1x16x32xbf16> to vector<16x32xbf16>
    %10 = vector.shape_cast %7 : vector<16x32xbf16> to vector<1x16x32xbf16>
    tpu.vector_store %arg4[%c0_6, %c0_7, %c0_8], %10 {strides = array<i32>} : memref<1x16x32xbf16, #tpu.memory_space<vmem>>, vector<1x16x32xbf16>,
    return
  }
  func.func @transform_0(%arg0: i32) -> (i32, i32, i32) {
    %c0_i32 = arith.constant 0 : i32
    %c0_i32_0 = arith.constant 0 : i32
    %c0_i32_1 = arith.constant 0 : i32
    return %arg0, %c0_i32, %c0_i32_0 : i32, i32, i32
  }
  func.func @transform_1(%arg0: i32) -> (i32, i32) {
    %c0_i32 = arith.constant 0 : i32
    %c0_i32_0 = arith.constant 0 : i32
    %c0_i32_1 = arith.constant 0 : i32
    return %c0_i32, %c0_i32_0 : i32, i32
  }
  func.func @transform_2(%arg0: i32) -> (i32, i32) {
    %c0_i32 = arith.constant 0 : i32
    %c0_i32_0 = arith.constant 0 : i32
    %c0_i32_1 = arith.constant 0 : i32
    return %c0_i32, %c0_i32_0 : i32, i32
  }
  func.func @transform_3(%arg0: i32) -> (i32, i32, i32) {
    %c0_i32 = arith.constant 0 : i32
    %c0_i32_0 = arith.constant 0 : i32
    %c0_i32_1 = arith.constant 0 : i32
    return %arg0, %c0_i32, %c0_i32_0 : i32, i32, i32
  }
}

</mosaic_0001>

<bundles_post_ra>
// kernel: tpu_custom_call.1
= control target key start
LH: loop header
LB: loop body
LE: loop exit
PB: predicated region body
PF: predicated region fallthrough
CT: control target
= control target key end

     0   :  { %8 = vsyncpa [#allocation3], 0  ;;  %s702_s0 = inlined_call_operand.vmem [shape: bf16[2,16,128], index: 0, kind: input, shape index: {}]   ;;  %s703_s1 = inlined_call_operand.vmem [shape: bf16[128,32], index: 1, kind: input, shape index: {}]   ;;  %s704_s2 = inlined_call_operand.vmem [shape: f32[1,32], index: 2, kind: input, shape index: {}]   ;;  %s705_s3 = inlined_call_operand.hbm [shape: bf16[2,16,32], index: 3, kind: output, shape index: {}]  }
   0x1   :  { %10 = vsyncpa [#allocation3 + $0x1], 0  ;;  %s573_s12 = smov 0   ;;  %s575_s13 = smov 0  }
   0x2   :  { %s577_s14 = smov 0   ;;  %s579_s15 = smov 0  }
   0x3 LB: > { %s594_s16 = sadd.s32 4294967295, %s546_s15   ;;  %s377_s17 = sadd.s32 4294967294, %s546_s15   ;;  %s546_s15 = sphi %s579_s15, %s711_s15   ;;  %s542_s14 = sphi %s577_s14, %s710_s14   ;;  %s538_s13 = sphi %s575_s13, %s709_s13   ;;  %s534_s12 = sphi %s573_s12, %s708_s12  }
   0x4   : > { %s598_s18 = sadd.s32 1, %s546_s15   ;;  %s91_s19 = sadd.s32 1, %s542_s14 }
   0x5   : > { %s88_s20 = ssub.s32 %s546_s15, %s598_s18  ;;  %p101_p0 = scmp.ne.s32.totalorder %s542_s14, %s538_s13 }
   0x6   : > { %p89_p1 = scmp.eq.s32.totalorder %s88_s20, 0  ;;  %p102_p2 = scmp.eq.s32.totalorder %s594_s16, 1 }
   0x7   : > { %p107_p3 = scmp.ne.s32.totalorder %s538_s13, %s534_s12  ;;  %p108_p4 = scmp.eq.s32.totalorder %s377_s17, 1 }
   0x8   : > { %s609_s21 = scalar_select %p89_p1, %s542_s14, %s91_s19  }
   0x9   : > { %p611_p5 = por %p102_p2, %p101_p0  ;;  %p615_p6 = por %p108_p4, %p107_p3 }
   0xa   : > { %p380_p7 = scmp.ge.s32.totalorder %s546_s15, 1  ;;  %p140_p8 = scmp.lt.s32.totalorder %s546_s15, 3 }
   0xc   : > { %p141_p9 = pnand %p380_p7, %p140_p8 }
   0xd   : > { %p164_p10 = scmp.lt.s32.totalorder (!%p141_p9), %s594_s16, 1  ;;  %s161_s27 = sand.u32 (!%p141_p9), 1, %s538_s13  }
   0xe   : > { %144 = sbr.rel (%p141_p9) target bundleno = 267 (0x10b), region = 32  ;;  %s381_s30 = sshll.u32 (!%p141_p9), %s161_s27, 3 }
   0xf   : > { %s404_s6 = sshll.u32 (!%p141_p9), %s594_s16, 7  ;;  %s662_s10 = scalar_lea.sflag (!%p141_p9), [#allocation3], %s161_s27 }
  0x10   : > { %s660_s9 = scalar_lea.hbm (!%p141_p9), %s705_s3, %s404_s6 }
  0x13   : > { %v477_v0 = vld [vmem:[%s703_s1 + $0x38] sm:$0xff]   ;;  %v548_v1 = vmov 0.0   ;;  %v478_v2 = vld [vmem:[%s703_s1 + $0x30] sm:$0xff]   ;;  %vm549_vm0 = vmmov 0   ;;  %s165_s28 = scalar_select %p164_p10, %s594_s16, 1  ;;  %v479_v3 = vld [vmem:[%s703_s1 + $0x28] sm:$0xff]  }
  0x14   : > { %414 = vmatprep.subr.bf16.mxu0 %v548_v1  ;;  %430 = vmatprep.mubr.msk.bf16.mxu0 %vm549_vm0, %v548_v1  ;;  %v480_v4 = vld [vmem:[%s703_s1 + $0x20] sm:$0xff]   ;;  %v481_v5 = vld [vmem:[%s703_s1 + $0x18] sm:$0xff]   ;;  %v482_v6 = vld [vmem:[%s703_s1 + $0x10] sm:$0xff]   ;;  %vm298_vm1 = vcmask 257024   ;;  %s550_s16 = smov [#allocation2]  }
  0x15   : > { %415 = vmatpush3.bf16.msra.mxu0 %v477_v0  ;;  %s401_s4 = sshll.u32 %s165_s28, 3  ;;  %v483_v7 = vld [vmem:[%s703_s1 + $0x8] sm:$0xff]   ;;  %v484_v8 = vld [vmem:[%s703_s1] sm:$0xff]   ;;  %s490_s17 = sshll.u32 %s550_s16, 4  ;;  %s491_s17 = int_to_ptr.vmem [resolvable:$false] %s490_s17 }
  0x16   : > { %416 = vmatprep.subr.bf16.mxu0 %v548_v1  ;;  %s168_s7 = scalar_lea.vmem %s702_s0, %s401_s4  ;;  %v384_v10 = vld [vmem:[%s704_s2] ss:$0 sm:$0xff]  ;;  %s163_s4 = scalar_lea.vmem [#allocation2], %s381_s30 }
  0x17   : > { %v485_v9 = vld [vmem:[%s168_s7] sm:$0xff]   ;;  %s315_s5 = sshll.u32 %s163_s4, 4  ;;  %s492_s19 = scalar_lea.vmem %s491_s17, 256  ;;  %s655_s5 = int_to_ptr.vmem [resolvable:$true] %s315_s5 }
  0x18   : > { %s486_s11 = scalar_lea.vmem %s655_s5, 128  ;;  %p493_p0 = scmp.lt.s32.totalorder %s655_s5, %s491_s17 }
  0x19   : > { %417 = vmatpush3.bf16.msra.mxu0 %v478_v2  ;;  %p487_p11 = scmp.ne.s32.totalorder %s655_s5, %s486_s11  ;;  %p494_p1 = scmp.lt.s32.totalorder %s492_s19, %s486_s11 }
  0x1a   : > { %418 = vmatprep.subr.bf16.mxu0 %v548_v1 }
  0x1b   : > { %p488_p12 = pnand %p487_p11, %p611_p5  ;;  %p495_p2 = por %p494_p1, %p493_p0 }
  0x1d   : > { %419 = vmatpush3.bf16.msra.mxu0 %v479_v3  ;;  %p489_p13 = pneg %p488_p12 }
  0x1e   : > { %420 = vmatprep.subr.bf16.mxu0 %v548_v1 }
  0x1f   : > { %p496_p3 = pnand %p495_p2, %p489_p13 }
  0x21   : > { %421 = vmatpush3.bf16.msra.mxu0 %v480_v4 }
  0x22   : > { %422 = vmatprep.subr.bf16.mxu0 %v548_v1 }
  0x25   : > { %423 = vmatpush3.bf16.msra.mxu0 %v481_v5 }
  0x26   : > { %424 = vmatprep.subr.bf16.mxu0 %v548_v1 }
  0x29   : > { %425 = vmatpush3.bf16.msra.mxu0 %v482_v6 }
  0x2a   : > { %426 = vmatprep.subr.bf16.mxu0 %v548_v1 }
  0x2d   : > { %427 = vmatpush3.bf16.msra.mxu0 %v483_v7 }
  0x2e   : > { %428 = vmatprep.subr.bf16.mxu0 %v548_v1 }
  0x31   : > { %429 = vmatpush3.bf16.msra.mxu0 %v484_v8 }
  0x34   : > { %431 = vmatmul.mubr.bf16.vlgmr.msra.gmra.mxu0 %v485_v9 }
  0xf4   : > { %v283_v11 = vpop.f32.mrf.mxu0 }
  0xf5   : > { %v284_v12 = vadd.f32 %v384_v10, %v283_v11 }
  0xf6   : > { %v432_v13 = vpop.f32.mrf.mxu0 }
  0xf7   : > { %v402_v14 = vpack.c.bf16 %v284_v12, %v284_v12 }
  0xf8   : > { %v286_v15 = vpop.f32.mrf.mxu0 }
  0xf9   : > { %299 = vst.msk [vmem:[%s163_s4] sm:$0xf] %vm298_vm1, %v402_v14  ;;  %v287_v16 = vadd.f32 %v384_v10, %v286_v15 }
  0xfa   : > { %v433_v17 = vpop.f32.mrf.mxu0 }
  0xfb   : > { %v403_v18 = vpack.c.bf16 %v287_v16, %v287_v16 }
  0xfd   : > { %300 = vst.msk [vmem:[%s163_s4 + $0x4] sm:$0xf] %vm298_vm1, %v403_v18 }
  0xfe   : > { %499 = shalt.err (!%p496_p3)
}
  0xff   : > { %s500_s20 = scalar_lea.hbm %s660_s9, 128  ;;  %s504_s26 = scalar_lea.hbm %s705_s3, 256 }
 0x100   : > { %p501_p4 = scmp.ne.s32.totalorder %s660_s9, %s500_s20  ;;  %p505_p9 = scmp.lt.s32.totalorder %s660_s9, %s705_s3 }
 0x101   : > { %p506_p10 = scmp.lt.s32.totalorder %s504_s26, %s500_s20 }
 0x102   : > { %p502_p7 = pnand %p501_p4, %p611_p5 }
 0x103   : > { %p507_p11 = por %p506_p10, %p505_p9 }
 0x104   : > { %p503_p8 = pneg %p502_p7 }
 0x106   : > { %p508_p12 = pnand %p507_p11, %p503_p8 }
 0x108   : > { %511 = shalt.err (!%p508_p12)
}
 0x109   : > { %s551_s29 = smov 64   ;;  %s552_s30 = smov 4  }
 0x10a   : > { %434 = dma.vmem_to_hbm [thread:$0]  (%p611_p5), %s655_s5, 128, %s660_s9, %s662_s10, %s551_s29, %s551_s29, %s552_s30  }
 0x10b PF: > { %p440_p13 = scmp.ge.s32.totalorder %s546_s15, 2  ;;  %s330_s4 = sand.u32 1, %s534_s12  }
 0x10c   : > { %s331_s6 = scalar_lea.sflag [#allocation3], %s330_s4 }
 0x10d   : > { %p437_p0 = pnand %p440_p13, %p615_p6 }
 0x10f   : > { %p438_p1 = pneg %p437_p0 }
 0x111   : > { %529 = dma.done.wait (%p438_p1), %s331_s6, 128  }
 0x112   : > { %531 = vsyncadd (%p438_p1), %s331_s6, 4294967168  ;;  %p13_p2 = scmp.ge.s32.totalorder %s598_s18, 4   ;;  %s708_s12 = smov %s538_s13 }
 0x113   : > { %s709_s13 = smov %s542_s14  ;;  %s710_s14 = smov %s609_s21 }
 0x114   : > { %s711_s15 = smov %s598_s18  ;;  %15 = sbr.rel (!%p13_p2) target bundleno = 3 (0x3), region = 67 }
 0x119   :  { %336 = vsyncpa [#allocation3], 1 }
 0x11a   :  { %338 = vsyncpa [#allocation3 + $0x1], 1 }

</bundles_post_ra>
